<compile_context>
chip_gen: v5e
topology: v5e:2x2
jax: 0.10.0
libtpu: 0.0.40
codegen_flags: <defaults>
</compile_context>

<pallas_src>
import functools

import jax
import jax.numpy as jnp
from jax.experimental import pallas as pl
from jax.experimental.pallas import tpu as pltpu


_LANE = 128
_SUBLANE = 8
_MAX_CHUNKS = 64                      # bounds the static chunk unroll per step
_FOLD_TARGET_ROWS = 256               # fold (B, D) -> (B*G, D//G) toward this
_DEFAULT_MIN_PALLAS_BYTES = 1 << 20   # layers smaller than this run in plain XLA


# ----------------------------------------------------------------------------
# Hardware queries (all best-effort; conservative fallbacks).
# ----------------------------------------------------------------------------
def _device_kind() -> str:
    try:
        return jax.devices()[0].device_kind.lower()
    except Exception:
        return ""


def _vmem_capacity_bytes() -> int:
    try:
        return int(pltpu.get_tpu_info().vmem_capacity_bytes)
    except Exception:
        return 64 * 1024 * 1024  # conservative: v7x per-TensorCore VMEM


def _num_tensorcores() -> int:
    """TensorCores a 'parallel' grid axis can shard across (v7x dual-TC,
    v4/v5p megacore).  Single-TC parts (v5e, v6e) return 1."""
    kind = _device_kind()
    if any(tag in kind for tag in ("v7", "v4", "v5p")):
        return 2
    return 1


def _step_target_bytes() -> int:
    """Per-input-block DMA bytes per grid step (amortizes ~0.35us step cost)."""
    kind = _device_kind()
    if "v7" in kind:
        return 6 << 20     # ~3.2 TB/s per TC: needs fat steps
    if "v6" in kind:
        return 4 << 20
    return 2 << 20         # v5e (~0.82 TB/s) / unknown


# ----------------------------------------------------------------------------
# Pallas kernel: per-row sum of squared differences over the feature axis.
#   x, y : (bt, tk) blocks of the (rows, d_eff) inputs, native dtype.
#   o    : (bt, 128) float32 lane-dense partial sums, resident across the
#          feature-tile (reduction) grid axis.
# Grid = (rows // bt  [parallel],  cdiv(d_eff, tk)  [arbitrary/reduction]).
# ----------------------------------------------------------------------------
def _ssd_kernel(x_ref, y_ref, o_ref, *, n_chunks, num_k, full_last, rag_cols):
    """Static params:
      n_chunks  : 128-wide chunks per full feature tile (tk // 128).
      num_k     : feature-grid extent.
      full_last : fully-valid 128-wide chunks in the last (ragged) tile.
      rag_cols  : valid columns in the last partial chunk (0 => none).
    """
    k = pl.program_id(1)

    @pl.when(k == 0)
    def _init():
        o_ref[...] = jnp.zeros_like(o_ref)

    def chunk_sq(c, acc, mask_cols=0):
        # Native-dtype load of one 128-lane chunk; cast/sub/square on the VPU.
        xs = x_ref[:, c * _LANE:(c + 1) * _LANE].astype(jnp.float32)
        ys = y_ref[:, c * _LANE:(c + 1) * _LANE].astype(jnp.float32)
        d = xs - ys
        if mask_cols:
            lane = jax.lax.broadcasted_iota(jnp.int32, d.shape, 1)
            d = jnp.where(lane < mask_cols, d, 0.0)   # mask BEFORE squaring
        return acc + d * d

    def accum(n_full, mask_cols):
        acc = jnp.zeros(o_ref.shape, jnp.float32)
        for c in range(n_full):
            acc = chunk_sq(c, acc)
        if mask_cols:
            acc = chunk_sq(n_full, acc, mask_cols)
        return acc

    ragged = (full_last != n_chunks) or (rag_cols != 0)
    if not ragged:
        # Uniform, unmasked steady state.
        o_ref[...] += accum(n_chunks, 0)
    elif num_k == 1:
        o_ref[...] += accum(full_last, rag_cols)
    else:
        last = num_k - 1

        @pl.when(k != last)
        def _steady():                       # unmasked steady state
            o_ref[...] += accum(n_chunks, 0)

        @pl.when(k == last)
        def _tail():                         # masked, only valid chunks
            o_ref[...] += accum(full_last, rag_cols)


# ----------------------------------------------------------------------------
# Tiling heuristics.
# ----------------------------------------------------------------------------
def _fold_rows(B, D, min_itemsize):
    """Free row-major reshape (B, D) -> (B*G, D//G): fills sublanes for tiny
    batches and lets the batch block carry the per-step DMA size."""
    del min_itemsize
    G = 1
    while (B * G < _FOLD_TARGET_ROWS
           and D % (2 * G) == 0
           and (D // (2 * G)) % _LANE == 0
           and D // (2 * G) >= _LANE):
        G *= 2
    return G


def _choose_bt(rows, min_itemsize, n_cores):
    """Rows per block.  Dual-TC parts want a shardable 'parallel' axis
    (extent >= n_cores); single-TC parts want one fat block."""
    min_bt = _SUBLANE * max(1, 4 // min_itemsize)   # 8 f32 / 16 bf16 / 32 int8
    max_bt = 1024
    if n_cores >= 2:
        for parts in (n_cores, 2 * n_cores, 4 * n_cores):
            if rows % parts == 0:
                bt = rows // parts
                if bt % min_bt == 0 and min_bt <= bt <= max_bt:
                    return bt
    if rows <= max_bt:
        return rows
    for bt in range(max_bt, min_bt - 1, -min_bt):
        if rows % bt == 0:
            return bt
    return rows            # full extent is always a legal block shape


def _choose_tk(bt, d_eff, itemsize, vmem_cap, step_target):
    # 2 inputs x 2 pipeline buffers of (bt, tk) must fit VMEM with headroom.
    vmem_per_block = max(bt * _LANE * itemsize, (vmem_cap - (24 << 20)) // 4)
    blk_bytes = min(step_target, vmem_per_block)
    tk = (blk_bytes // (bt * itemsize)) // _LANE * _LANE
    tk = min(tk, _MAX_CHUNKS * _LANE)                    # bound static unroll
    tk = min(tk, max(_LANE, (d_eff // _LANE) * _LANE))   # don't overshoot D
    return max(tk, _LANE)


# ----------------------------------------------------------------------------
# Per-sample sum of squared differences via Pallas.
# ----------------------------------------------------------------------------
def _per_sample_ssd(x2d: jax.Array, y2d: jax.Array) -> jax.Array:
    """x2d, y2d: (B, D) -> (B,) float32 sum of squared diffs."""
    B, D = x2d.shape
    isz_x = jnp.dtype(x2d.dtype).itemsize
    isz_y = jnp.dtype(y2d.dtype).itemsize
    max_isz, min_isz = max(isz_x, isz_y), min(isz_x, isz_y)

    n_cores = _num_tensorcores()
    vmem_cap = _vmem_capacity_bytes()

    # Free fold: (B, D) -> (B*G, D//G).
    G = _fold_rows(B, D, min_isz)
    rows, d_eff = B * G, D // G
    xf = x2d.reshape(rows, d_eff)
    yf = y2d.reshape(rows, d_eff)

    bt = _choose_bt(rows, min_isz, n_cores)
    tk = _choose_tk(bt, d_eff, max_isz, vmem_cap, _step_target_bytes())

    num_k = pl.cdiv(d_eff, tk)
    n_chunks = tk // _LANE
    tail_cols = d_eff - (num_k - 1) * tk       # in (0, tk]
    full_last = tail_cols // _LANE
    rag_cols = tail_cols % _LANE

    kernel = functools.partial(_ssd_kernel, n_chunks=n_chunks, num_k=num_k,
                               full_last=full_last, rag_cols=rag_cols)

    blk_in = bt * tk * max_isz
    blk_out = bt * _LANE * 4
    vmem_limit = int(min(vmem_cap,
                         max(32 << 20, 4 * blk_in + 2 * blk_out + (8 << 20))))

    out = pl.pallas_call(
        kernel,
        out_shape=jax.ShapeDtypeStruct((rows, _LANE), jnp.float32),
        grid_spec=pltpu.PrefetchScalarGridSpec(
            num_scalar_prefetch=0,
            grid=(rows // bt, num_k),
            in_specs=[
                pl.BlockSpec((bt, tk), lambda b, k: (b, k)),
                pl.BlockSpec((bt, tk), lambda b, k: (b, k)),
            ],
            out_specs=pl.BlockSpec((bt, _LANE), lambda b, k: (b, 0)),
        ),
        compiler_params=pltpu.CompilerParams(
            dimension_semantics=("parallel", "arbitrary"),
            vmem_limit_bytes=vmem_limit,
        ),
        cost_estimate=pl.CostEstimate(
            flops=int(3 * B * D),
            transcendentals=0,
            bytes_accessed=int(B * D * (isz_x + isz_y) + rows * _LANE * 4),
        ),
    )(xf, yf)

    # Tiny final cross-lane reduction (B x G*128 -> B) in plain JAX.
    return jnp.sum(out.reshape(B, -1), axis=-1)


def _per_sample_mse(a_flat: jax.Array, b_flat: jax.Array, *,
                    min_pallas_bytes: int = _DEFAULT_MIN_PALLAS_BYTES) -> jax.Array:
    """Per-sample MSE over flattened features; Pallas for large layers."""
    B, D = a_flat.shape
    layer_bytes = B * D * (jnp.dtype(a_flat.dtype).itemsize
                           + jnp.dtype(b_flat.dtype).itemsize)
    if D < _LANE or layer_bytes < min_pallas_bytes:
        # Tiny layer: launch + pipeline warm-up exceeds the useful work; an
        # XLA fusion already handles it at roofline.
        d = a_flat.astype(jnp.float32) - b_flat.astype(jnp.float32)
        return jnp.mean(d * d, axis=1)
    return _per_sample_ssd(a_flat, b_flat) / jnp.float32(D)


# ----------------------------------------------------------------------------
# ActivationLoss equivalent.
# ----------------------------------------------------------------------------
class ActivationLossPallas:
    """JAX/Pallas port of ActivationLoss with loss_fn = per-sample MSE and
    aggr_fn = sum over layers (the PyTorch default aggregation)."""

    # TODO(synk): arbitrary user-supplied loss_fn/aggr_fn callables run as
    # plain JAX; only the default per-sample MSE is backed by the Pallas kernel.
    def __init__(self, loss_fn=None, aggr_fn=None,
                 min_pallas_bytes: int = _DEFAULT_MIN_PALLAS_BYTES):
        if loss_fn is None:
            loss_fn = functools.partial(_per_sample_mse,
                                        min_pallas_bytes=min_pallas_bytes)
        if aggr_fn is None:
            aggr_fn = lambda losses: jnp.sum(losses, axis=-1)
        self.loss_fn = loss_fn
        self.aggr_fn = aggr_fn

    def __call__(self, *args):
        keys = list(args[0].keys())
        per_layer = []
        # TODO(synk): same-dtype medium layers could be fused into one
        # pallas_call over a concatenated feature view to amortize launches.
        for key in keys:
            flats = [arg[key].reshape(arg[key].shape[0], -1) for arg in args]
            per_layer.append(self.loss_fn(*flats))            # (B,)
        losses = jnp.stack(per_layer, axis=-1)                 # (B, num_layers)
        return jnp.mean(self.aggr_fn(losses))                  # scalar


# ----------------------------------------------------------------------------
# Demo / self-test
# ----------------------------------------------------------------------------
if __name__ == "__main__":
    key = jax.random.PRNGKey(0)
    ks = jax.random.split(key, 8)

    B = 2
    # Four "layers" chosen to exercise every code path at small sizes:
    #   conv0: f32,  D=65536 -> folded to (256, 512): multi-chunk, unmasked
    #   conv1: bf16, D=1024  -> folded to (16, 128): native-dtype DMA + cast
    #   conv2: f32,  D=300   -> no fold: ragged last tile (masked-tail path)
    #   fc   : f32,  D=32    -> plain-JAX fallback (below one lane width)
    acts_a = {
        "conv0": jax.random.normal(ks[0], (B, 64, 32, 32), jnp.float32),
        "conv1": jax.random.normal(ks[1], (B, 4, 16, 16), jnp.bfloat16),
        "conv2": jax.random.normal(ks[2], (B, 3, 10, 10), jnp.float32),
        "fc":    jax.random.normal(ks[3], (B, 32), jnp.float32),
    }
    acts_b = {
        "conv0": jax.random.normal(ks[4], (B, 64, 32, 32), jnp.float32),
        "conv1": jax.random.normal(ks[5], (B, 4, 16, 16), jnp.bfloat16),
        "conv2": jax.random.normal(ks[6], (B, 3, 10, 10), jnp.float32),
        "fc":    jax.random.normal(ks[7], (B, 32), jnp.float32),
    }

    # The self-test lowers the Pallas byte-cutoff to 0 so the kernel path is
    # exercised at these small demo shapes; the production default is ~1 MiB.
    module = ActivationLossPallas(min_pallas_bytes=0)
    out = jax.block_until_ready(module(acts_a, acts_b))

    # Pure-JAX reference for correctness.
    def ref_fn(a, b):
        per_layer = []
        for kk in a.keys():
            af = a[kk].reshape(B, -1).astype(jnp.float32)
            bf = b[kk].reshape(B, -1).astype(jnp.float32)
            per_layer.append(jnp.mean((af - bf) ** 2, axis=1))
        return jnp.mean(jnp.sum(jnp.stack(per_layer, axis=-1), axis=-1))

    ref = jax.block_until_ready(ref_fn(acts_a, acts_b))
    assert jnp.allclose(out, ref, rtol=1e-4, atol=1e-4), (out, ref)

    print("KERNEL_OK")
</pallas_src>

<mosaic_0001>
module attributes {stable_mosaic.version = 11 : i64} {
  func.func @_ssd_kernel(%arg0: i32, %arg1: i32, %arg2: memref<256x512xf32, #tpu.memory_space<vmem>>, %arg3: memref<256x512xf32, #tpu.memory_space<vmem>>, %arg4: memref<256x128xf32, #tpu.memory_space<vmem>>) attributes {dimension_semantics = [#tpu.dimension_semantics<parallel>, #tpu.dimension_semantics<arbitrary>], iteration_bounds = array<i64: 1, 1>, scalar_prefetch = 0 : i64, scratch_operands = 0 : i64, tpu.core_type = #tpu.core_type<tc>, window_params = [{transform_indices = @transform_0, window_bounds = array<i64: 256, 512>}, {transform_indices = @transform_1, window_bounds = array<i64: 256, 512>}, {transform_indices = @transform_2, window_bounds = array<i64: 256, 128>}]} {
    %c0_i32 = arith.constant 0 : i32
    %0 = arith.cmpi eq, %arg1, %c0_i32 : i32
    %1 = arith.extui %0 : i1 to i32
    %c0_i32_0 = arith.constant 0 : i32
    %2 = arith.cmpi ne, %1, %c0_i32_0 : i32
    scf.if %2 {
      %cst_17 = arith.constant 0.000000e+00 : f32
      %27 = vector.broadcast %cst_17 : f32 to vector<256x128xf32>
      %c0_18 = arith.constant 0 : index
      %c0_19 = arith.constant 0 : index
      %28 = vector.load %arg4[%c0_18, %c0_19] : memref<256x128xf32, #tpu.memory_space<vmem>>, vector<256x128xf32>
      tpu.vector_store %arg4[%c0_18, %c0_19], %27 {strides = array<i32>} : memref<256x128xf32, #tpu.memory_space<vmem>>, vector<256x128xf32>,
    } else {
    }
    %c0 = arith.constant 0 : index
    %c0_1 = arith.constant 0 : index
    %3 = vector.load %arg4[%c0, %c0_1] : memref<256x128xf32, #tpu.memory_space<vmem>>, vector<256x128xf32>
    %cst = arith.constant 0.000000e+00 : f32
    %4 = vector.broadcast %cst : f32 to vector<256x128xf32>
    %c0_2 = arith.constant 0 : index
    %c0_3 = arith.constant 0 : index
    %5 = vector.load %arg2[%c0_2, %c0_3] : memref<256x512xf32, #tpu.memory_space<vmem>>, vector<256x128xf32>
    %c0_4 = arith.constant 0 : index
    %c0_5 = arith.constant 0 : index
    %6 = vector.load %arg3[%c0_4, %c0_5] : memref<256x512xf32, #tpu.memory_space<vmem>>, vector<256x128xf32>
    %7 = arith.subf %5, %6 : vector<256x128xf32>
    %8 = arith.mulf %7, %7 : vector<256x128xf32>
    %9 = arith.addf %4, %8 : vector<256x128xf32>
    %c0_6 = arith.constant 0 : index
    %c128 = arith.constant 128 : index
    %10 = vector.load %arg2[%c0_6, %c128] : memref<256x512xf32, #tpu.memory_space<vmem>>, vector<256x128xf32>
    %c0_7 = arith.constant 0 : index
    %c128_8 = arith.constant 128 : index
    %11 = vector.load %arg3[%c0_7, %c128_8] : memref<256x512xf32, #tpu.memory_space<vmem>>, vector<256x128xf32>
    %12 = arith.subf %10, %11 : vector<256x128xf32>
    %13 = arith.mulf %12, %12 : vector<256x128xf32>
    %14 = arith.addf %9, %13 : vector<256x128xf32>
    %c0_9 = arith.constant 0 : index
    %c256 = arith.constant 256 : index
    %15 = vector.load %arg2[%c0_9, %c256] : memref<256x512xf32, #tpu.memory_space<vmem>>, vector<256x128xf32>
    %c0_10 = arith.constant 0 : index
    %c256_11 = arith.constant 256 : index
    %16 = vector.load %arg3[%c0_10, %c256_11] : memref<256x512xf32, #tpu.memory_space<vmem>>, vector<256x128xf32>
    %17 = arith.subf %15, %16 : vector<256x128xf32>
    %18 = arith.mulf %17, %17 : vector<256x128xf32>
    %19 = arith.addf %14, %18 : vector<256x128xf32>
    %c0_12 = arith.constant 0 : index
    %c384 = arith.constant 384 : index
    %20 = vector.load %arg2[%c0_12, %c384] : memref<256x512xf32, #tpu.memory_space<vmem>>, vector<256x128xf32>
    %c0_13 = arith.constant 0 : index
    %c384_14 = arith.constant 384 : index
    %21 = vector.load %arg3[%c0_13, %c384_14] : memref<256x512xf32, #tpu.memory_space<vmem>>, vector<256x128xf32>
    %22 = arith.subf %20, %21 : vector<256x128xf32>
    %23 = arith.mulf %22, %22 : vector<256x128xf32>
    %24 = arith.addf %19, %23 : vector<256x128xf32>
    %25 = arith.addf %3, %24 : vector<256x128xf32>
    %c0_15 = arith.constant 0 : index
    %c0_16 = arith.constant 0 : index
    %26 = vector.load %arg4[%c0_15, %c0_16] : memref<256x128xf32, #tpu.memory_space<vmem>>, vector<256x128xf32>
    tpu.vector_store %arg4[%c0_15, %c0_16], %25 {strides = array<i32>} : memref<256x128xf32, #tpu.memory_space<vmem>>, vector<256x128xf32>,
    return
  }
  func.func @transform_0(%arg0: i32, %arg1: i32) -> (i32, i32) {
    %c0_i32 = arith.constant 0 : i32
    return %arg0, %arg1 : i32, i32
  }
  func.func @transform_1(%arg0: i32, %arg1: i32) -> (i32, i32) {
    %c0_i32 = arith.constant 0 : i32
    return %arg0, %arg1 : i32, i32
  }
  func.func @transform_2(%arg0: i32, %arg1: i32) -> (i32, i32) {
    %c0_i32 = arith.constant 0 : i32
    %c0_i32_0 = arith.constant 0 : i32
    return %arg0, %c0_i32 : i32, i32
  }
}

</mosaic_0001>

<bundles_post_ra>
// kernel: tpu_custom_call.1
= control target key start
LH: loop header
LB: loop body
LE: loop exit
PB: predicated region body
PF: predicated region fallthrough
CT: control target
= control target key end

     0   :  { %7 = vsyncpa [#allocation3], 0  ;;  %s953_s0 = inlined_call_operand.hbm [shape: f32[256,512], index: 0, kind: input, shape index: {}]   ;;  %s954_s1 = inlined_call_operand.hbm [shape: f32[256,512], index: 1, kind: input, shape index: {}]   ;;  %s955_s2 = inlined_call_operand.hbm [shape: f32[256,128], index: 2, kind: output, shape index: {}]  }
   0x1   :  { %8 = vsyncpa [#allocation6], 0 }
   0x2   :  { %9 = vsyncpa [#allocation4], 0  ;;  %s14_s11 = sshll.u32 %s953_s0, 4  ;;  %s922_s12 = smov [#allocation2]   ;;  %s15_s11 = int_to_ptr.hbm [resolvable:$true] %s14_s11 }
   0x3   :  { %s16_s13 = sshll.u32 %s922_s12, 4  ;;  %s27_s16 = sshll.u32 %s954_s1, 4  ;;  %s17_s13 = int_to_ptr.vmem [resolvable:$true] %s16_s13  ;;  %s28_s16 = int_to_ptr.hbm [resolvable:$true] %s27_s16 }
   0x4   :  { %s923_s17 = smov 512   ;;  %s924_s18 = smov 32  }
   0x5   :  { %22 = dma.hbm_to_vmem [thread:$0]  %s15_s11, 16384, %s17_s13, [#allocation3], %s923_s17, %s923_s17, %s924_s18  }
   0x6   :  { %s925_s19 = smov [#allocation5]  }
   0x7   :  { %s29_s20 = sshll.u32 %s925_s19, 4  ;;  %s30_s20 = int_to_ptr.vmem [resolvable:$true] %s29_s20 }
   0x8   :  { %35 = dma.hbm_to_vmem [thread:$0]  %s28_s16, 16384, %s30_s20, [#allocation6], %s923_s17, %s923_s17, %s924_s18  }
   0x9   :  { %916 = dma.done.wait [#allocation3], 16384  }
   0xa   :  { %917 = vsyncadd [#allocation3], 4294950912 }
   0xb   :  { %918 = dma.done.wait [#allocation6], 16384  }
   0xc   :  { %919 = vsyncadd [#allocation6], 4294950912  ;;  %v112_v0 = vld [vmem:[#allocation2] sm:$0xff]  ;;  %v272_v2 = vld [vmem:[#allocation2 + $0x8] sm:$0xff]  ;;  %s926_s0 = smov [#allocation7]   ;;  %s822_s23 = sshll.u32 %s955_s2, 4  ;;  %s823_s23 = int_to_ptr.hbm [resolvable:$true] %s822_s23 }
   0xd   :  { %v144_v1 = vld [vmem:[#allocation5] sm:$0xff]  ;;  %v304_v4 = vld [vmem:[#allocation5 + $0x8] sm:$0xff]  ;;  %v432_v5 = vld [vmem:[#allocation2 + $0x10] sm:$0xff]  ;;  %s820_s1 = sshll.u32 %s926_s0, 4  ;;  %s927_s24 = smov 128   ;;  %s821_s1 = int_to_ptr.vmem [resolvable:$true] %s820_s1 }
   0xe   :  { %v176_v3 = vsub.f32 %v112_v0, %v144_v1  ;;  %v464_v6 = vld [vmem:[#allocation5 + $0x10] sm:$0xff]  ;;  %v336_v7 = vsub.f32 %v272_v2, %v304_v4  ;;  %v592_v9 = vld [vmem:[#allocation2 + $0x18] sm:$0xff]  ;;  %v113_v11 = vld [vmem:[#allocation2 + $0x20] sm:$0xff]  ;;  %s928_s25 = smov 8  }
   0xf   :  { %v496_v8 = vsub.f32 %v432_v5, %v464_v6  ;;  %v624_v10 = vld [vmem:[#allocation5 + $0x18] sm:$0xff]  ;;  %v145_v14 = vld [vmem:[#allocation5 + $0x20] sm:$0xff]  ;;  %v273_v15 = vld [vmem:[#allocation2 + $0x28] sm:$0xff] }
  0x10   :  { %v208_v12 = vmul.f32 %v176_v3, %v176_v3  ;;  %v656_v13 = vsub.f32 %v592_v9, %v624_v10  ;;  %v305_v16 = vld [vmem:[#allocation5 + $0x28] sm:$0xff]  ;;  %v368_v17 = vmul.f32 %v336_v7, %v336_v7  ;;  %v177_v19 = vsub.f32 %v113_v11, %v145_v14  ;;  %v433_v21 = vld [vmem:[#allocation2 + $0x30] sm:$0xff]  ;;  %v593_v23 = vld [vmem:[#allocation2 + $0x38] sm:$0xff] }
  0x11   :  { %v528_v18 = vmul.f32 %v496_v8, %v496_v8  ;;  %v337_v20 = vsub.f32 %v273_v15, %v305_v16  ;;  %v465_v22 = vld [vmem:[#allocation5 + $0x30] sm:$0xff]  ;;  %v625_v26 = vld [vmem:[#allocation5 + $0x38] sm:$0xff]  ;;  %v114_v27 = vld [vmem:[#allocation2 + $0x40] sm:$0xff] }
  0x12   :  { %v688_v24 = vmul.f32 %v656_v13, %v656_v13  ;;  %v497_v25 = vsub.f32 %v433_v21, %v465_v22  ;;  %v146_v28 = vld [vmem:[#allocation5 + $0x40] sm:$0xff]  ;;  %v400_v29 = vadd.f32 %v368_v17, %v208_v12  ;;  %v209_v30 = vmul.f32 %v177_v19, %v177_v19  ;;  %v274_v33 = vld [vmem:[#allocation2 + $0x48] sm:$0xff]  ;;  %v434_v35 = vld [vmem:[#allocation2 + $0x50] sm:$0xff] }
  0x13   :  { %v369_v31 = vmul.f32 %v337_v20, %v337_v20  ;;  %v657_v32 = vsub.f32 %v593_v23, %v625_v26  ;;  %v306_v34 = vld [vmem:[#allocation5 + $0x48] sm:$0xff]  ;;  %v178_v37 = vsub.f32 %v114_v27, %v146_v28  ;;  %v466_v39 = vld [vmem:[#allocation5 + $0x50] sm:$0xff]  ;;  %v594_v40 = vld [vmem:[#allocation2 + $0x58] sm:$0xff] }
  0x14   :  { %v529_v36 = vmul.f32 %v497_v25, %v497_v25  ;;  %v338_v38 = vsub.f32 %v274_v33, %v306_v34  ;;  %v626_v41 = vld [vmem:[#allocation5 + $0x58] sm:$0xff]  ;;  %v560_v42 = vadd.f32 %v528_v18, %v400_v29  ;;  %v498_v45 = vsub.f32 %v434_v35, %v466_v39  ;;  %v115_v46 = vld [vmem:[#allocation2 + $0x60] sm:$0xff]  ;;  %v275_v48 = vld [vmem:[#allocation2 + $0x68] sm:$0xff] }
  0x15   :  { %v401_v43 = vadd.f32 %v369_v31, %v209_v30  ;;  %v689_v44 = vmul.f32 %v657_v32, %v657_v32  ;;  %v147_v47 = vld [vmem:[#allocation5 + $0x60] sm:$0xff]  ;;  %v210_v49 = vmul.f32 %v178_v37, %v178_v37  ;;  %v658_v51 = vsub.f32 %v594_v40, %v626_v41  ;;  %v307_v53 = vld [vmem:[#allocation5 + $0x68] sm:$0xff]  ;;  %v435_v54 = vld [vmem:[#allocation2 + $0x70] sm:$0xff] }
  0x16   :  { %v370_v50 = vmul.f32 %v338_v38, %v338_v38  ;;  %v179_v52 = vsub.f32 %v115_v46, %v147_v47  ;;  %v467_v55 = vld [vmem:[#allocation5 + $0x70] sm:$0xff]  ;;  %v720_v56 = vadd.f32 %v688_v24, %v560_v42  ;;  %v530_v58 = vmul.f32 %v498_v45, %v498_v45  ;;  %v595_v60 = vld [vmem:[#allocation2 + $0x78] sm:$0xff]  ;;  %v116_v62 = vld [vmem:[#allocation2 + $0x80] sm:$0xff] }
  0x17   :  { %v561_v57 = vadd.f32 %v529_v36, %v401_v43  ;;  %v339_v59 = vsub.f32 %v275_v48, %v307_v53  ;;  %v627_v61 = vld [vmem:[#allocation5 + $0x78] sm:$0xff]  ;;  %v690_v0 = vmul.f32 %v658_v51, %v658_v51  ;;  %v499_v2 = vsub.f32 %v435_v54, %v467_v55  ;;  %v148_v3 = vld [vmem:[#allocation5 + $0x80] sm:$0xff]  ;;  %v276_v4 = vld [vmem:[#allocation2 + $0x88] sm:$0xff] }
  0x18   :  { %v402_v63 = vadd.f32 %v370_v50, %v210_v49  ;;  %v211_v1 = vmul.f32 %v179_v52, %v179_v52  ;;  %v308_v5 = vld [vmem:[#allocation5 + $0x88] sm:$0xff]  ;;  %v659_v8 = vsub.f32 %v595_v60, %v627_v61  ;;  %v436_v9 = vld [vmem:[#allocation2 + $0x90] sm:$0xff]  ;;  %v596_v11 = vld [vmem:[#allocation2 + $0x98] sm:$0xff]  ;;  %v180_v14 = vsub.f32 %v116_v62, %v148_v3  ;;  %784 = vst [vmem:[#allocation7] sm:$0xff] %v720_v56 }
  0x19   :  { %v721_v6 = vadd.f32 %v689_v44, %v561_v57  ;;  %v371_v7 = vmul.f32 %v339_v59, %v339_v59  ;;  %v468_v10 = vld [vmem:[#allocation5 + $0x90] sm:$0xff]  ;;  %v531_v13 = vmul.f32 %v499_v2, %v499_v2  ;;  %v340_v15 = vsub.f32 %v276_v4, %v308_v5  ;;  %v628_v16 = vld [vmem:[#allocation5 + $0x98] sm:$0xff]  ;;  %v117_v17 = vld [vmem:[#allocation2 + $0xa0] sm:$0xff] }
  0x1a   :  { %v562_v12 = vadd.f32 %v530_v58, %v402_v63  ;;  %v149_v18 = vld [vmem:[#allocation5 + $0xa0] sm:$0xff]  ;;  %v691_v20 = vmul.f32 %v659_v8, %v659_v8  ;;  %v500_v21 = vsub.f32 %v436_v9, %v468_v10  ;;  %v277_v22 = vld [vmem:[#allocation2 + $0xa8] sm:$0xff]  ;;  %v437_v24 = vld [vmem:[#allocation2 + $0xb0] sm:$0xff]  ;;  %v212_v26 = vmul.f32 %v180_v14, %v180_v14 }
  0x1b   :  { %v403_v19 = vadd.f32 %v371_v7, %v211_v1  ;;  %v309_v23 = vld [vmem:[#allocation5 + $0xa8] sm:$0xff]  ;;  %v372_v27 = vmul.f32 %v340_v15, %v340_v15  ;;  %v660_v28 = vsub.f32 %v596_v11, %v628_v16  ;;  %v469_v29 = vld [vmem:[#allocation5 + $0xb0] sm:$0xff]  ;;  %v597_v30 = vld [vmem:[#allocation2 + $0xb8] sm:$0xff]  ;;  %785 = vst [vmem:[#allocation7 + $0x8] sm:$0xff] %v721_v6  ;;  %v181_v34 = vsub.f32 %v117_v17, %v149_v18 }
  0x1c   :  { %v722_v25 = vadd.f32 %v690_v0, %v562_v12  ;;  %v629_v31 = vld [vmem:[#allocation5 + $0xb8] sm:$0xff]  ;;  %v532_v33 = vmul.f32 %v500_v21, %v500_v21  ;;  %v341_v35 = vsub.f32 %v277_v22, %v309_v23  ;;  %v118_v36 = vld [vmem:[#allocation2 + $0xc0] sm:$0xff]  ;;  %v278_v38 = vld [vmem:[#allocation2 + $0xc8] sm:$0xff]  ;;  %v501_v41 = vsub.f32 %v437_v24, %v469_v29 }
  0x1d   :  { %v563_v32 = vadd.f32 %v531_v13, %v403_v19  ;;  %v150_v37 = vld [vmem:[#allocation5 + $0xc0] sm:$0xff]  ;;  %v404_v39 = vadd.f32 %v372_v27, %v212_v26  ;;  %v692_v40 = vmul.f32 %v660_v28, %v660_v28  ;;  %v310_v42 = vld [vmem:[#allocation5 + $0xc8] sm:$0xff]  ;;  %v438_v43 = vld [vmem:[#allocation2 + $0xd0] sm:$0xff]  ;;  %v213_v46 = vmul.f32 %v181_v34, %v181_v34 }
  0x1e   :  { %v470_v44 = vld [vmem:[#allocation5 + $0xd0] sm:$0xff]  ;;  %v373_v47 = vmul.f32 %v341_v35, %v341_v35  ;;  %v661_v48 = vsub.f32 %v597_v30, %v629_v31  ;;  %v598_v49 = vld [vmem:[#allocation2 + $0xd8] sm:$0xff]  ;;  %v119_v51 = vld [vmem:[#allocation2 + $0xe0] sm:$0xff]  ;;  %786 = vst [vmem:[#allocation7 + $0x10] sm:$0xff] %v722_v25  ;;  %v533_v53 = vmul.f32 %v501_v41, %v501_v41  ;;  %v182_v54 = vsub.f32 %v118_v36, %v150_v37 }
  0x1f   :  { %v723_v45 = vadd.f32 %v691_v20, %v563_v32  ;;  %v630_v50 = vld [vmem:[#allocation5 + $0xd8] sm:$0xff]  ;;  %v564_v52 = vadd.f32 %v532_v33, %v404_v39  ;;  %v342_v55 = vsub.f32 %v278_v38, %v310_v42  ;;  %v151_v56 = vld [vmem:[#allocation5 + $0xe0] sm:$0xff]  ;;  %v279_v57 = vld [vmem:[#allocation2 + $0xe8] sm:$0xff]  ;;  %v502_v61 = vsub.f32 %v438_v43, %v470_v44 }
  0x20   :  { %v311_v58 = vld [vmem:[#allocation5 + $0xe8] sm:$0xff]  ;;  %v405_v59 = vadd.f32 %v373_v47, %v213_v46  ;;  %v693_v60 = vmul.f32 %v661_v48, %v661_v48  ;;  %v439_v62 = vld [vmem:[#allocation2 + $0xf0] sm:$0xff]  ;;  %v214_v1 = vmul.f32 %v182_v54, %v182_v54  ;;  %v662_v3 = vsub.f32 %v598_v49, %v630_v50  ;;  %v599_v4 = vld [vmem:[#allocation2 + $0xf8] sm:$0xff] }
  0x21   :  { %v471_v63 = vld [vmem:[#allocation5 + $0xf0] sm:$0xff]  ;;  %v724_v0 = vadd.f32 %v692_v40, %v564_v52  ;;  %v374_v2 = vmul.f32 %v342_v55, %v342_v55  ;;  %v631_v5 = vld [vmem:[#allocation5 + $0xf8] sm:$0xff]  ;;  %v120_v6 = vld [vmem:[#allocation2 + $0x100] sm:$0xff]  ;;  %787 = vst [vmem:[#allocation7 + $0x18] sm:$0xff] %v723_v45  ;;  %v534_v8 = vmul.f32 %v502_v61, %v502_v61  ;;  %v183_v9 = vsub.f32 %v119_v51, %v151_v56 }
  0x22   :  { %v565_v7 = vadd.f32 %v533_v53, %v405_v59  ;;  %v343_v10 = vsub.f32 %v279_v57, %v311_v58  ;;  %v152_v11 = vld [vmem:[#allocation5 + $0x100] sm:$0xff]  ;;  %v280_v12 = vld [vmem:[#allocation2 + $0x108] sm:$0xff]  ;;  %v694_v15 = vmul.f32 %v662_v3, %v662_v3  ;;  %v503_v16 = vsub.f32 %v439_v62, %v471_v63  ;;  %v440_v17 = vld [vmem:[#allocation2 + $0x110] sm:$0xff] }
  0x23   :  { %v312_v13 = vld [vmem:[#allocation5 + $0x108] sm:$0xff]  ;;  %v406_v14 = vadd.f32 %v374_v2, %v214_v1  ;;  %v472_v18 = vld [vmem:[#allocation5 + $0x110] sm:$0xff]  ;;  %v215_v20 = vmul.f32 %v183_v9, %v183_v9  ;;  %v663_v22 = vsub.f32 %v599_v4, %v631_v5  ;;  %v600_v23 = vld [vmem:[#allocation2 + $0x118] sm:$0xff]  ;;  %788 = vst [vmem:[#allocation7 + $0x20] sm:$0xff] %v724_v0  ;;  %v184_v28 = vsub.f32 %v120_v6, %v152_v11 }
  0x24   :  { %v725_v19 = vadd.f32 %v693_v60, %v565_v7  ;;  %v375_v21 = vmul.f32 %v343_v10, %v343_v10  ;;  %v632_v24 = vld [vmem:[#allocation5 + $0x118] sm:$0xff]  ;;  %v121_v25 = vld [vmem:[#allocation2 + $0x120] sm:$0xff]  ;;  %v535_v27 = vmul.f32 %v503_v16, %v503_v16  ;;  %v344_v29 = vsub.f32 %v280_v12, %v312_v13  ;;  %v281_v31 = vld [vmem:[#allocation2 + $0x128] sm:$0xff] }
  0x25   :  { %v566_v26 = vadd.f32 %v534_v8, %v406_v14  ;;  %v153_v30 = vld [vmem:[#allocation5 + $0x120] sm:$0xff]  ;;  %v313_v32 = vld [vmem:[#allocation5 + $0x128] sm:$0xff]  ;;  %v695_v34 = vmul.f32 %v663_v22, %v663_v22  ;;  %v504_v35 = vsub.f32 %v440_v17, %v472_v18  ;;  %v441_v36 = vld [vmem:[#allocation2 + $0x130] sm:$0xff]  ;;  %v216_v39 = vmul.f32 %v184_v28, %v184_v28 }
  0x26   :  { %v407_v33 = vadd.f32 %v375_v21, %v215_v20  ;;  %v473_v37 = vld [vmem:[#allocation5 + $0x130] sm:$0xff]  ;;  %v376_v40 = vmul.f32 %v344_v29, %v344_v29  ;;  %v664_v41 = vsub.f32 %v600_v23, %v632_v24  ;;  %v601_v42 = vld [vmem:[#allocation2 + $0x138] sm:$0xff]  ;;  %v122_v44 = vld [vmem:[#allocation2 + $0x140] sm:$0xff]  ;;  %789 = vst [vmem:[#allocation7 + $0x28] sm:$0xff] %v725_v19  ;;  %v185_v47 = vsub.f32 %v121_v25, %v153_v30 }
  0x27   :  { %v726_v38 = vadd.f32 %v694_v15, %v566_v26  ;;  %v633_v43 = vld [vmem:[#allocation5 + $0x138] sm:$0xff]  ;;  %v536_v46 = vmul.f32 %v504_v35, %v504_v35  ;;  %v345_v48 = vsub.f32 %v281_v31, %v313_v32  ;;  %v154_v49 = vld [vmem:[#allocation5 + $0x140] sm:$0xff]  ;;  %v282_v50 = vld [vmem:[#allocation2 + $0x148] sm:$0xff]  ;;  %v505_v54 = vsub.f32 %v441_v36, %v473_v37 }
  0x28   :  { %v567_v45 = vadd.f32 %v535_v27, %v407_v33  ;;  %v314_v51 = vld [vmem:[#allocation5 + $0x148] sm:$0xff]  ;;  %v408_v52 = vadd.f32 %v376_v40, %v216_v39  ;;  %v696_v53 = vmul.f32 %v664_v41, %v664_v41  ;;  %v442_v55 = vld [vmem:[#allocation2 + $0x150] sm:$0xff]  ;;  %v217_v58 = vmul.f32 %v185_v47, %v185_v47  ;;  %v602_v61 = vld [vmem:[#allocation2 + $0x158] sm:$0xff] }
  0x29   :  { %v474_v56 = vld [vmem:[#allocation5 + $0x150] sm:$0xff]  ;;  %v377_v59 = vmul.f32 %v345_v48, %v345_v48  ;;  %v665_v60 = vsub.f32 %v601_v42, %v633_v43  ;;  %v634_v62 = vld [vmem:[#allocation5 + $0x158] sm:$0xff]  ;;  %v123_v63 = vld [vmem:[#allocation2 + $0x160] sm:$0xff]  ;;  %790 = vst [vmem:[#allocation7 + $0x30] sm:$0xff] %v726_v38  ;;  %v537_v1 = vmul.f32 %v505_v54, %v505_v54  ;;  %v186_v2 = vsub.f32 %v122_v44, %v154_v49 }
  0x2a   :  { %v727_v57 = vadd.f32 %v695_v34, %v567_v45  ;;  %v568_v0 = vadd.f32 %v536_v46, %v408_v52  ;;  %v346_v3 = vsub.f32 %v282_v50, %v314_v51  ;;  %v155_v4 = vld [vmem:[#allocation5 + $0x160] sm:$0xff]  ;;  %v283_v5 = vld [vmem:[#allocation2 + $0x168] sm:$0xff]  ;;  %v506_v9 = vsub.f32 %v442_v55, %v474_v56  ;;  %v443_v10 = vld [vmem:[#allocation2 + $0x170] sm:$0xff] }
  0x2b   :  { %v315_v6 = vld [vmem:[#allocation5 + $0x168] sm:$0xff]  ;;  %v409_v7 = vadd.f32 %v377_v59, %v217_v58  ;;  %v697_v8 = vmul.f32 %v665_v60, %v665_v60  ;;  %v475_v11 = vld [vmem:[#allocation5 + $0x170] sm:$0xff]  ;;  %v218_v13 = vmul.f32 %v186_v2, %v186_v2  ;;  %v666_v15 = vsub.f32 %v602_v61, %v634_v62  ;;  %v603_v16 = vld [vmem:[#allocation2 + $0x178] sm:$0xff] }
  0x2c   :  { %v728_v12 = vadd.f32 %v696_v53, %v568_v0  ;;  %v378_v14 = vmul.f32 %v346_v3, %v346_v3  ;;  %v635_v17 = vld [vmem:[#allocation5 + $0x178] sm:$0xff]  ;;  %v124_v18 = vld [vmem:[#allocation2 + $0x180] sm:$0xff]  ;;  %791 = vst [vmem:[#allocation7 + $0x38] sm:$0xff] %v727_v57  ;;  %v538_v20 = vmul.f32 %v506_v9, %v506_v9  ;;  %v187_v21 = vsub.f32 %v123_v63, %v155_v4  ;;  %v284_v24 = vld [vmem:[#allocation2 + $0x188] sm:$0xff] }
  0x2d   :  { %v569_v19 = vadd.f32 %v537_v1, %v409_v7  ;;  %v347_v22 = vsub.f32 %v283_v5, %v315_v6  ;;  %v156_v23 = vld [vmem:[#allocation5 + $0x180] sm:$0xff]  ;;  %v316_v25 = vld [vmem:[#allocation5 + $0x188] sm:$0xff]  ;;  %v698_v27 = vmul.f32 %v666_v15, %v666_v15  ;;  %v507_v28 = vsub.f32 %v443_v10, %v475_v11  ;;  %v444_v29 = vld [vmem:[#allocation2 + $0x190] sm:$0xff] }
  0x2e   :  { %v410_v26 = vadd.f32 %v378_v14, %v218_v13  ;;  %v476_v30 = vld [vmem:[#allocation5 + $0x190] sm:$0xff]  ;;  %v219_v32 = vmul.f32 %v187_v21, %v187_v21  ;;  %v667_v34 = vsub.f32 %v603_v16, %v635_v17  ;;  %v604_v35 = vld [vmem:[#allocation2 + $0x198] sm:$0xff]  ;;  %v125_v37 = vld [vmem:[#allocation2 + $0x1a0] sm:$0xff]  ;;  %792 = vst [vmem:[#allocation7 + $0x40] sm:$0xff] %v728_v12  ;;  %v188_v40 = vsub.f32 %v124_v18, %v156_v23 }
  0x2f   :  { %v729_v31 = vadd.f32 %v697_v8, %v569_v19  ;;  %v379_v33 = vmul.f32 %v347_v22, %v347_v22  ;;  %v636_v36 = vld [vmem:[#allocation5 + $0x198] sm:$0xff]  ;;  %v539_v39 = vmul.f32 %v507_v28, %v507_v28  ;;  %v348_v41 = vsub.f32 %v284_v24, %v316_v25  ;;  %v157_v42 = vld [vmem:[#allocation5 + $0x1a0] sm:$0xff]  ;;  %v285_v43 = vld [vmem:[#allocation2 + $0x1a8] sm:$0xff] }
  0x30   :  { %v570_v38 = vadd.f32 %v538_v20, %v410_v26  ;;  %v317_v44 = vld [vmem:[#allocation5 + $0x1a8] sm:$0xff]  ;;  %v699_v46 = vmul.f32 %v667_v34, %v667_v34  ;;  %v508_v47 = vsub.f32 %v444_v29, %v476_v30  ;;  %v445_v48 = vld [vmem:[#allocation2 + $0x1b0] sm:$0xff]  ;;  %v220_v51 = vmul.f32 %v188_v40, %v188_v40  ;;  %v605_v54 = vld [vmem:[#allocation2 + $0x1b8] sm:$0xff] }
  0x31   :  { %v411_v45 = vadd.f32 %v379_v33, %v219_v32  ;;  %v477_v49 = vld [vmem:[#allocation5 + $0x1b0] sm:$0xff]  ;;  %v380_v52 = vmul.f32 %v348_v41, %v348_v41  ;;  %v668_v53 = vsub.f32 %v604_v35, %v636_v36  ;;  %v637_v55 = vld [vmem:[#allocation5 + $0x1b8] sm:$0xff]  ;;  %v126_v56 = vld [vmem:[#allocation2 + $0x1c0] sm:$0xff]  ;;  %793 = vst [vmem:[#allocation7 + $0x48] sm:$0xff] %v729_v31  ;;  %v189_v59 = vsub.f32 %v125_v37, %v157_v42 }
  0x32   :  { %v730_v50 = vadd.f32 %v698_v27, %v570_v38  ;;  %v540_v58 = vmul.f32 %v508_v47, %v508_v47  ;;  %v349_v60 = vsub.f32 %v285_v43, %v317_v44  ;;  %v158_v61 = vld [vmem:[#allocation5 + $0x1c0] sm:$0xff]  ;;  %v286_v62 = vld [vmem:[#allocation2 + $0x1c8] sm:$0xff]  ;;  %v509_v2 = vsub.f32 %v445_v48, %v477_v49  ;;  %v446_v3 = vld [vmem:[#allocation2 + $0x1d0] sm:$0xff] }
  0x33   :  { %v571_v57 = vadd.f32 %v539_v39, %v411_v45  ;;  %v318_v63 = vld [vmem:[#allocation5 + $0x1c8] sm:$0xff]  ;;  %v412_v0 = vadd.f32 %v380_v52, %v220_v51  ;;  %v700_v1 = vmul.f32 %v668_v53, %v668_v53  ;;  %v478_v4 = vld [vmem:[#allocation5 + $0x1d0] sm:$0xff]  ;;  %v221_v6 = vmul.f32 %v189_v59, %v189_v59  ;;  %v606_v9 = vld [vmem:[#allocation2 + $0x1d8] sm:$0xff] }
  0x34   :  { %v381_v7 = vmul.f32 %v349_v60, %v349_v60  ;;  %v669_v8 = vsub.f32 %v605_v54, %v637_v55  ;;  %v638_v10 = vld [vmem:[#allocation5 + $0x1d8] sm:$0xff]  ;;  %v127_v11 = vld [vmem:[#allocation2 + $0x1e0] sm:$0xff]  ;;  %794 = vst [vmem:[#allocation7 + $0x50] sm:$0xff] %v730_v50  ;;  %v541_v13 = vmul.f32 %v509_v2, %v509_v2  ;;  %v190_v14 = vsub.f32 %v126_v56, %v158_v61  ;;  %v287_v17 = vld [vmem:[#allocation2 + $0x1e8] sm:$0xff] }
  0x35   :  { %v731_v5 = vadd.f32 %v699_v46, %v571_v57  ;;  %v572_v12 = vadd.f32 %v540_v58, %v412_v0  ;;  %v350_v15 = vsub.f32 %v286_v62, %v318_v63  ;;  %v159_v16 = vld [vmem:[#allocation5 + $0x1e0] sm:$0xff]  ;;  %v319_v18 = vld [vmem:[#allocation5 + $0x1e8] sm:$0xff]  ;;  %v510_v21 = vsub.f32 %v446_v3, %v478_v4  ;;  %v447_v22 = vld [vmem:[#allocation2 + $0x1f0] sm:$0xff] }
  0x36   :  { %v413_v19 = vadd.f32 %v381_v7, %v221_v6  ;;  %v701_v20 = vmul.f32 %v669_v8, %v669_v8  ;;  %v479_v23 = vld [vmem:[#allocation5 + $0x1f0] sm:$0xff]  ;;  %v222_v25 = vmul.f32 %v190_v14, %v190_v14  ;;  %v670_v27 = vsub.f32 %v606_v9, %v638_v10  ;;  %v607_v28 = vld [vmem:[#allocation2 + $0x1f8] sm:$0xff]  ;;  %v128_v30 = vld [vmem:[#allocation2 + $0x200] sm:$0xff] }
  0x37   :  { %v732_v24 = vadd.f32 %v700_v1, %v572_v12  ;;  %v382_v26 = vmul.f32 %v350_v15, %v350_v15  ;;  %v639_v29 = vld [vmem:[#allocation5 + $0x1f8] sm:$0xff]  ;;  %795 = vst [vmem:[#allocation7 + $0x58] sm:$0xff] %v731_v5  ;;  %v542_v32 = vmul.f32 %v510_v21, %v510_v21  ;;  %v191_v33 = vsub.f32 %v127_v11, %v159_v16  ;;  %v160_v35 = vld [vmem:[#allocation5 + $0x200] sm:$0xff]  ;;  %v288_v36 = vld [vmem:[#allocation2 + $0x208] sm:$0xff] }
  0x38   :  { %v573_v31 = vadd.f32 %v541_v13, %v413_v19  ;;  %v351_v34 = vsub.f32 %v287_v17, %v319_v18  ;;  %v320_v37 = vld [vmem:[#allocation5 + $0x208] sm:$0xff]  ;;  %v702_v39 = vmul.f32 %v670_v27, %v670_v27  ;;  %v511_v40 = vsub.f32 %v447_v22, %v479_v23  ;;  %v448_v41 = vld [vmem:[#allocation2 + $0x210] sm:$0xff]  ;;  %v608_v47 = vld [vmem:[#allocation2 + $0x218] sm:$0xff] }
  0x39   :  { %v414_v38 = vadd.f32 %v382_v26, %v222_v25  ;;  %v480_v42 = vld [vmem:[#allocation5 + $0x210] sm:$0xff]  ;;  %v223_v44 = vmul.f32 %v191_v33, %v191_v33  ;;  %v671_v46 = vsub.f32 %v607_v28, %v639_v29  ;;  %v640_v48 = vld [vmem:[#allocation5 + $0x218] sm:$0xff]  ;;  %v129_v49 = vld [vmem:[#allocation2 + $0x220] sm:$0xff]  ;;  %796 = vst [vmem:[#allocation7 + $0x60] sm:$0xff] %v732_v24  ;;  %v192_v52 = vsub.f32 %v128_v30, %v160_v35 }
  0x3a   :  { %v733_v43 = vadd.f32 %v701_v20, %v573_v31  ;;  %v383_v45 = vmul.f32 %v351_v34, %v351_v34  ;;  %v543_v51 = vmul.f32 %v511_v40, %v511_v40  ;;  %v352_v53 = vsub.f32 %v288_v36, %v320_v37  ;;  %v161_v54 = vld [vmem:[#allocation5 + $0x220] sm:$0xff]  ;;  %v289_v55 = vld [vmem:[#allocation2 + $0x228] sm:$0xff]  ;;  %v449_v60 = vld [vmem:[#allocation2 + $0x230] sm:$0xff] }
  0x3b   :  { %v574_v50 = vadd.f32 %v542_v32, %v414_v38  ;;  %v321_v56 = vld [vmem:[#allocation5 + $0x228] sm:$0xff]  ;;  %v703_v58 = vmul.f32 %v671_v46, %v671_v46  ;;  %v512_v59 = vsub.f32 %v448_v41, %v480_v42  ;;  %v481_v61 = vld [vmem:[#allocation5 + $0x230] sm:$0xff]  ;;  %v224_v63 = vmul.f32 %v192_v52, %v192_v52  ;;  %v609_v2 = vld [vmem:[#allocation2 + $0x238] sm:$0xff] }
  0x3c   :  { %v415_v57 = vadd.f32 %v383_v45, %v223_v44  ;;  %v384_v0 = vmul.f32 %v352_v53, %v352_v53  ;;  %v672_v1 = vsub.f32 %v608_v47, %v640_v48  ;;  %v641_v3 = vld [vmem:[#allocation5 + $0x238] sm:$0xff]  ;;  %v130_v4 = vld [vmem:[#allocation2 + $0x240] sm:$0xff]  ;;  %797 = vst [vmem:[#allocation7 + $0x68] sm:$0xff] %v733_v43  ;;  %v193_v7 = vsub.f32 %v129_v49, %v161_v54  ;;  %v290_v10 = vld [vmem:[#allocation2 + $0x248] sm:$0xff] }
  0x3d   :  { %v734_v62 = vadd.f32 %v702_v39, %v574_v50  ;;  %v544_v6 = vmul.f32 %v512_v59, %v512_v59  ;;  %v353_v8 = vsub.f32 %v289_v55, %v321_v56  ;;  %v162_v9 = vld [vmem:[#allocation5 + $0x240] sm:$0xff]  ;;  %v322_v11 = vld [vmem:[#allocation5 + $0x248] sm:$0xff]  ;;  %v513_v14 = vsub.f32 %v449_v60, %v481_v61  ;;  %v450_v15 = vld [vmem:[#allocation2 + $0x250] sm:$0xff] }
  0x3e   :  { %v575_v5 = vadd.f32 %v543_v51, %v415_v57  ;;  %v416_v12 = vadd.f32 %v384_v0, %v224_v63  ;;  %v704_v13 = vmul.f32 %v672_v1, %v672_v1  ;;  %v482_v16 = vld [vmem:[#allocation5 + $0x250] sm:$0xff]  ;;  %v225_v18 = vmul.f32 %v193_v7, %v193_v7  ;;  %v610_v21 = vld [vmem:[#allocation2 + $0x258] sm:$0xff]  ;;  %v131_v23 = vld [vmem:[#allocation2 + $0x260] sm:$0xff] }
  0x3f   :  { %v385_v19 = vmul.f32 %v353_v8, %v353_v8  ;;  %v673_v20 = vsub.f32 %v609_v2, %v641_v3  ;;  %v642_v22 = vld [vmem:[#allocation5 + $0x258] sm:$0xff]  ;;  %798 = vst [vmem:[#allocation7 + $0x70] sm:$0xff] %v734_v62  ;;  %v545_v25 = vmul.f32 %v513_v14, %v513_v14  ;;  %v194_v26 = vsub.f32 %v130_v4, %v162_v9  ;;  %v163_v28 = vld [vmem:[#allocation5 + $0x260] sm:$0xff]  ;;  %v291_v29 = vld [vmem:[#allocation2 + $0x268] sm:$0xff] }
  0x40   :  { %v735_v17 = vadd.f32 %v703_v58, %v575_v5  ;;  %v576_v24 = vadd.f32 %v544_v6, %v416_v12  ;;  %v354_v27 = vsub.f32 %v290_v10, %v322_v11  ;;  %v323_v30 = vld [vmem:[#allocation5 + $0x268] sm:$0xff]  ;;  %v514_v33 = vsub.f32 %v450_v15, %v482_v16  ;;  %v451_v34 = vld [vmem:[#allocation2 + $0x270] sm:$0xff]  ;;  %v611_v40 = vld [vmem:[#allocation2 + $0x278] sm:$0xff] }
  0x41   :  { %v417_v31 = vadd.f32 %v385_v19, %v225_v18  ;;  %v705_v32 = vmul.f32 %v673_v20, %v673_v20  ;;  %v483_v35 = vld [vmem:[#allocation5 + $0x270] sm:$0xff]  ;;  %v226_v37 = vmul.f32 %v194_v26, %v194_v26  ;;  %v674_v39 = vsub.f32 %v610_v21, %v642_v22  ;;  %v643_v41 = vld [vmem:[#allocation5 + $0x278] sm:$0xff]  ;;  %v132_v42 = vld [vmem:[#allocation2 + $0x280] sm:$0xff] }
  0x42   :  { %v736_v36 = vadd.f32 %v704_v13, %v576_v24  ;;  %v386_v38 = vmul.f32 %v354_v27, %v354_v27  ;;  %799 = vst [vmem:[#allocation7 + $0x78] sm:$0xff] %v735_v17  ;;  %v546_v44 = vmul.f32 %v514_v33, %v514_v33  ;;  %v195_v45 = vsub.f32 %v131_v23, %v163_v28  ;;  %v164_v47 = vld [vmem:[#allocation5 + $0x280] sm:$0xff]  ;;  %v292_v48 = vld [vmem:[#allocation2 + $0x288] sm:$0xff]  ;;  %v452_v53 = vld [vmem:[#allocation2 + $0x290] sm:$0xff] }
  0x43   :  { %v577_v43 = vadd.f32 %v545_v25, %v417_v31  ;;  %v355_v46 = vsub.f32 %v291_v29, %v323_v30  ;;  %v324_v49 = vld [vmem:[#allocation5 + $0x288] sm:$0xff]  ;;  %v706_v51 = vmul.f32 %v674_v39, %v674_v39  ;;  %v515_v52 = vsub.f32 %v451_v34, %v483_v35  ;;  %v484_v54 = vld [vmem:[#allocation5 + $0x290] sm:$0xff]  ;;  %v612_v59 = vld [vmem:[#allocation2 + $0x298] sm:$0xff] }
  0x44   :  { %v418_v50 = vadd.f32 %v386_v38, %v226_v37  ;;  %v227_v56 = vmul.f32 %v195_v45, %v195_v45  ;;  %v675_v58 = vsub.f32 %v611_v40, %v643_v41  ;;  %v644_v60 = vld [vmem:[#allocation5 + $0x298] sm:$0xff]  ;;  %v133_v61 = vld [vmem:[#allocation2 + $0x2a0] sm:$0xff]  ;;  %800 = vst [vmem:[#allocation7 + $0x80] sm:$0xff] %v736_v36  ;;  %v196_v0 = vsub.f32 %v132_v42, %v164_v47  ;;  %v293_v3 = vld [vmem:[#allocation2 + $0x2a8] sm:$0xff] }
  0x45   :  { %v737_v55 = vadd.f32 %v705_v32, %v577_v43  ;;  %v387_v57 = vmul.f32 %v355_v46, %v355_v46  ;;  %v547_v63 = vmul.f32 %v515_v52, %v515_v52  ;;  %v356_v1 = vsub.f32 %v292_v48, %v324_v49  ;;  %v165_v2 = vld [vmem:[#allocation5 + $0x2a0] sm:$0xff]  ;;  %v325_v4 = vld [vmem:[#allocation5 + $0x2a8] sm:$0xff]  ;;  %v453_v8 = vld [vmem:[#allocation2 + $0x2b0] sm:$0xff] }
  0x46   :  { %v578_v62 = vadd.f32 %v546_v44, %v418_v50  ;;  %v707_v6 = vmul.f32 %v675_v58, %v675_v58  ;;  %v516_v7 = vsub.f32 %v452_v53, %v484_v54  ;;  %v485_v9 = vld [vmem:[#allocation5 + $0x2b0] sm:$0xff]  ;;  %v228_v11 = vmul.f32 %v196_v0, %v196_v0  ;;  %v613_v14 = vld [vmem:[#allocation2 + $0x2b8] sm:$0xff]  ;;  %v134_v16 = vld [vmem:[#allocation2 + $0x2c0] sm:$0xff] }
  0x47   :  { %v419_v5 = vadd.f32 %v387_v57, %v227_v56  ;;  %v388_v12 = vmul.f32 %v356_v1, %v356_v1  ;;  %v676_v13 = vsub.f32 %v612_v59, %v644_v60  ;;  %v645_v15 = vld [vmem:[#allocation5 + $0x2b8] sm:$0xff]  ;;  %801 = vst [vmem:[#allocation7 + $0x88] sm:$0xff] %v737_v55  ;;  %v197_v19 = vsub.f32 %v133_v61, %v165_v2  ;;  %v166_v21 = vld [vmem:[#allocation5 + $0x2c0] sm:$0xff]  ;;  %v294_v22 = vld [vmem:[#allocation2 + $0x2c8] sm:$0xff] }
  0x48   :  { %v738_v10 = vadd.f32 %v706_v51, %v578_v62  ;;  %v548_v18 = vmul.f32 %v516_v7, %v516_v7  ;;  %v357_v20 = vsub.f32 %v293_v3, %v325_v4  ;;  %v326_v23 = vld [vmem:[#allocation5 + $0x2c8] sm:$0xff]  ;;  %v517_v26 = vsub.f32 %v453_v8, %v485_v9  ;;  %v454_v27 = vld [vmem:[#allocation2 + $0x2d0] sm:$0xff]  ;;  %v614_v33 = vld [vmem:[#allocation2 + $0x2d8] sm:$0xff] }
  0x49   :  { %v579_v17 = vadd.f32 %v547_v63, %v419_v5  ;;  %v420_v24 = vadd.f32 %v388_v12, %v228_v11  ;;  %v708_v25 = vmul.f32 %v676_v13, %v676_v13  ;;  %v486_v28 = vld [vmem:[#allocation5 + $0x2d0] sm:$0xff]  ;;  %v229_v30 = vmul.f32 %v197_v19, %v197_v19  ;;  %v646_v34 = vld [vmem:[#allocation5 + $0x2d8] sm:$0xff]  ;;  %v135_v35 = vld [vmem:[#allocation2 + $0x2e0] sm:$0xff] }
  0x4a   :  { %v389_v31 = vmul.f32 %v357_v20, %v357_v20  ;;  %v677_v32 = vsub.f32 %v613_v14, %v645_v15  ;;  %802 = vst [vmem:[#allocation7 + $0x90] sm:$0xff] %v738_v10  ;;  %v549_v37 = vmul.f32 %v517_v26, %v517_v26  ;;  %v198_v38 = vsub.f32 %v134_v16, %v166_v21  ;;  %v167_v40 = vld [vmem:[#allocation5 + $0x2e0] sm:$0xff]  ;;  %v295_v41 = vld [vmem:[#allocation2 + $0x2e8] sm:$0xff]  ;;  %v455_v46 = vld [vmem:[#allocation2 + $0x2f0] sm:$0xff] }
  0x4b   :  { %v739_v29 = vadd.f32 %v707_v6, %v579_v17  ;;  %v580_v36 = vadd.f32 %v548_v18, %v420_v24  ;;  %v358_v39 = vsub.f32 %v294_v22, %v326_v23  ;;  %v327_v42 = vld [vmem:[#allocation5 + $0x2e8] sm:$0xff]  ;;  %v518_v45 = vsub.f32 %v454_v27, %v486_v28  ;;  %v487_v47 = vld [vmem:[#allocation5 + $0x2f0] sm:$0xff]  ;;  %v615_v52 = vld [vmem:[#allocation2 + $0x2f8] sm:$0xff] }
  0x4c   :  { %v421_v43 = vadd.f32 %v389_v31, %v229_v30  ;;  %v709_v44 = vmul.f32 %v677_v32, %v677_v32  ;;  %v230_v49 = vmul.f32 %v198_v38, %v198_v38  ;;  %v678_v51 = vsub.f32 %v614_v33, %v646_v34  ;;  %v647_v53 = vld [vmem:[#allocation5 + $0x2f8] sm:$0xff]  ;;  %v136_v54 = vld [vmem:[#allocation2 + $0x300] sm:$0xff]  ;;  %v296_v60 = vld [vmem:[#allocation2 + $0x308] sm:$0xff] }
  0x4d   :  { %v740_v48 = vadd.f32 %v708_v25, %v580_v36  ;;  %v390_v50 = vmul.f32 %v358_v39, %v358_v39  ;;  %803 = vst [vmem:[#allocation7 + $0x98] sm:$0xff] %v739_v29  ;;  %v550_v56 = vmul.f32 %v518_v45, %v518_v45  ;;  %v199_v57 = vsub.f32 %v135_v35, %v167_v40  ;;  %v168_v59 = vld [vmem:[#allocation5 + $0x300] sm:$0xff]  ;;  %v328_v61 = vld [vmem:[#allocation5 + $0x308] sm:$0xff]  ;;  %v456_v1 = vld [vmem:[#allocation2 + $0x310] sm:$0xff] }
  0x4e   :  { %v581_v55 = vadd.f32 %v549_v37, %v421_v43  ;;  %v359_v58 = vsub.f32 %v295_v41, %v327_v42  ;;  %v710_v63 = vmul.f32 %v678_v51, %v678_v51  ;;  %v519_v0 = vsub.f32 %v455_v46, %v487_v47  ;;  %v488_v2 = vld [vmem:[#allocation5 + $0x310] sm:$0xff]  ;;  %v616_v7 = vld [vmem:[#allocation2 + $0x318] sm:$0xff]  ;;  %v137_v9 = vld [vmem:[#allocation2 + $0x320] sm:$0xff] }
  0x4f   :  { %v422_v62 = vadd.f32 %v390_v50, %v230_v49  ;;  %v231_v4 = vmul.f32 %v199_v57, %v199_v57  ;;  %v679_v6 = vsub.f32 %v615_v52, %v647_v53  ;;  %v648_v8 = vld [vmem:[#allocation5 + $0x318] sm:$0xff]  ;;  %804 = vst [vmem:[#allocation7 + $0xa0] sm:$0xff] %v740_v48  ;;  %v200_v12 = vsub.f32 %v136_v54, %v168_v59  ;;  %v169_v14 = vld [vmem:[#allocation5 + $0x320] sm:$0xff]  ;;  %v297_v15 = vld [vmem:[#allocation2 + $0x328] sm:$0xff] }
  0x50   :  { %v741_v3 = vadd.f32 %v709_v44, %v581_v55  ;;  %v391_v5 = vmul.f32 %v359_v58, %v359_v58  ;;  %v551_v11 = vmul.f32 %v519_v0, %v519_v0  ;;  %v360_v13 = vsub.f32 %v296_v60, %v328_v61  ;;  %v329_v16 = vld [vmem:[#allocation5 + $0x328] sm:$0xff]  ;;  %v457_v20 = vld [vmem:[#allocation2 + $0x330] sm:$0xff]  ;;  %v617_v26 = vld [vmem:[#allocation2 + $0x338] sm:$0xff] }
  0x51   :  { %v582_v10 = vadd.f32 %v550_v56, %v422_v62  ;;  %v711_v18 = vmul.f32 %v679_v6, %v679_v6  ;;  %v520_v19 = vsub.f32 %v456_v1, %v488_v2  ;;  %v489_v21 = vld [vmem:[#allocation5 + $0x330] sm:$0xff]  ;;  %v232_v23 = vmul.f32 %v200_v12, %v200_v12  ;;  %v649_v27 = vld [vmem:[#allocation5 + $0x338] sm:$0xff]  ;;  %v138_v28 = vld [vmem:[#allocation2 + $0x340] sm:$0xff] }
  0x52   :  { %v423_v17 = vadd.f32 %v391_v5, %v231_v4  ;;  %v392_v24 = vmul.f32 %v360_v13, %v360_v13  ;;  %v680_v25 = vsub.f32 %v616_v7, %v648_v8  ;;  %805 = vst [vmem:[#allocation7 + $0xa8] sm:$0xff] %v741_v3  ;;  %v201_v31 = vsub.f32 %v137_v9, %v169_v14  ;;  %v170_v33 = vld [vmem:[#allocation5 + $0x340] sm:$0xff]  ;;  %v298_v34 = vld [vmem:[#allocation2 + $0x348] sm:$0xff]  ;;  %v458_v39 = vld [vmem:[#allocation2 + $0x350] sm:$0xff] }
  0x53   :  { %v742_v22 = vadd.f32 %v710_v63, %v582_v10  ;;  %v552_v30 = vmul.f32 %v520_v19, %v520_v19  ;;  %v361_v32 = vsub.f32 %v297_v15, %v329_v16  ;;  %v330_v35 = vld [vmem:[#allocation5 + $0x348] sm:$0xff]  ;;  %v521_v38 = vsub.f32 %v457_v20, %v489_v21  ;;  %v490_v40 = vld [vmem:[#allocation5 + $0x350] sm:$0xff]  ;;  %v618_v45 = vld [vmem:[#allocation2 + $0x358] sm:$0xff] }
  0x54   :  { %v583_v29 = vadd.f32 %v551_v11, %v423_v17  ;;  %v424_v36 = vadd.f32 %v392_v24, %v232_v23  ;;  %v712_v37 = vmul.f32 %v680_v25, %v680_v25  ;;  %v233_v42 = vmul.f32 %v201_v31, %v201_v31  ;;  %v650_v46 = vld [vmem:[#allocation5 + $0x358] sm:$0xff]  ;;  %v139_v47 = vld [vmem:[#allocation2 + $0x360] sm:$0xff]  ;;  %v299_v53 = vld [vmem:[#allocation2 + $0x368] sm:$0xff] }
  0x55   :  { %v393_v43 = vmul.f32 %v361_v32, %v361_v32  ;;  %v681_v44 = vsub.f32 %v617_v26, %v649_v27  ;;  %806 = vst [vmem:[#allocation7 + $0xb0] sm:$0xff] %v742_v22  ;;  %v553_v49 = vmul.f32 %v521_v38, %v521_v38  ;;  %v202_v50 = vsub.f32 %v138_v28, %v170_v33  ;;  %v171_v52 = vld [vmem:[#allocation5 + $0x360] sm:$0xff]  ;;  %v331_v54 = vld [vmem:[#allocation5 + $0x368] sm:$0xff]  ;;  %v459_v58 = vld [vmem:[#allocation2 + $0x370] sm:$0xff] }
  0x56   :  { %v743_v41 = vadd.f32 %v711_v18, %v583_v29  ;;  %v584_v48 = vadd.f32 %v552_v30, %v424_v36  ;;  %v362_v51 = vsub.f32 %v298_v34, %v330_v35  ;;  %v522_v57 = vsub.f32 %v458_v39, %v490_v40  ;;  %v491_v59 = vld [vmem:[#allocation5 + $0x370] sm:$0xff]  ;;  %v619_v0 = vld [vmem:[#allocation2 + $0x378] sm:$0xff]  ;;  %v140_v2 = vld [vmem:[#allocation2 + $0x380] sm:$0xff] }
  0x57   :  { %v425_v55 = vadd.f32 %v393_v43, %v233_v42  ;;  %v713_v56 = vmul.f32 %v681_v44, %v681_v44  ;;  %v234_v61 = vmul.f32 %v202_v50, %v202_v50  ;;  %v682_v63 = vsub.f32 %v618_v45, %v650_v46  ;;  %v651_v1 = vld [vmem:[#allocation5 + $0x378] sm:$0xff]  ;;  %v172_v7 = vld [vmem:[#allocation5 + $0x380] sm:$0xff]  ;;  %v300_v8 = vld [vmem:[#allocation2 + $0x388] sm:$0xff] }
  0x58   :  { %v744_v60 = vadd.f32 %v712_v37, %v584_v48  ;;  %v394_v62 = vmul.f32 %v362_v51, %v362_v51  ;;  %807 = vst [vmem:[#allocation7 + $0xb8] sm:$0xff] %v743_v41  ;;  %v554_v4 = vmul.f32 %v522_v57, %v522_v57  ;;  %v203_v5 = vsub.f32 %v139_v47, %v171_v52  ;;  %v332_v9 = vld [vmem:[#allocation5 + $0x388] sm:$0xff]  ;;  %v460_v13 = vld [vmem:[#allocation2 + $0x390] sm:$0xff]  ;;  %v620_v19 = vld [vmem:[#allocation2 + $0x398] sm:$0xff] }
  0x59   :  { %v585_v3 = vadd.f32 %v553_v49, %v425_v55  ;;  %v363_v6 = vsub.f32 %v299_v53, %v331_v54  ;;  %v714_v11 = vmul.f32 %v682_v63, %v682_v63  ;;  %v523_v12 = vsub.f32 %v459_v58, %v491_v59  ;;  %v492_v14 = vld [vmem:[#allocation5 + $0x390] sm:$0xff]  ;;  %v652_v20 = vld [vmem:[#allocation5 + $0x398] sm:$0xff]  ;;  %v141_v21 = vld [vmem:[#allocation2 + $0x3a0] sm:$0xff] }
  0x5a   :  { %v426_v10 = vadd.f32 %v394_v62, %v234_v61  ;;  %v235_v16 = vmul.f32 %v203_v5, %v203_v5  ;;  %v683_v18 = vsub.f32 %v619_v0, %v651_v1  ;;  %808 = vst [vmem:[#allocation7 + $0xc0] sm:$0xff] %v744_v60  ;;  %v204_v24 = vsub.f32 %v140_v2, %v172_v7  ;;  %v173_v26 = vld [vmem:[#allocation5 + $0x3a0] sm:$0xff]  ;;  %v301_v27 = vld [vmem:[#allocation2 + $0x3a8] sm:$0xff]  ;;  %v461_v32 = vld [vmem:[#allocation2 + $0x3b0] sm:$0xff] }
  0x5b   :  { %v745_v15 = vadd.f32 %v713_v56, %v585_v3  ;;  %v395_v17 = vmul.f32 %v363_v6, %v363_v6  ;;  %v555_v23 = vmul.f32 %v523_v12, %v523_v12  ;;  %v364_v25 = vsub.f32 %v300_v8, %v332_v9  ;;  %v333_v28 = vld [vmem:[#allocation5 + $0x3a8] sm:$0xff]  ;;  %v493_v33 = vld [vmem:[#allocation5 + $0x3b0] sm:$0xff]  ;;  %v621_v38 = vld [vmem:[#allocation2 + $0x3b8] sm:$0xff] }
  0x5c   :  { %v586_v22 = vadd.f32 %v554_v4, %v426_v10  ;;  %v715_v30 = vmul.f32 %v683_v18, %v683_v18  ;;  %v524_v31 = vsub.f32 %v460_v13, %v492_v14  ;;  %v236_v35 = vmul.f32 %v204_v24, %v204_v24  ;;  %v653_v39 = vld [vmem:[#allocation5 + $0x3b8] sm:$0xff]  ;;  %v142_v40 = vld [vmem:[#allocation2 + $0x3c0] sm:$0xff]  ;;  %v302_v46 = vld [vmem:[#allocation2 + $0x3c8] sm:$0xff] }
  0x5d   :  { %v427_v29 = vadd.f32 %v395_v17, %v235_v16  ;;  %v396_v36 = vmul.f32 %v364_v25, %v364_v25  ;;  %v684_v37 = vsub.f32 %v620_v19, %v652_v20  ;;  %809 = vst [vmem:[#allocation7 + $0xc8] sm:$0xff] %v745_v15  ;;  %v205_v43 = vsub.f32 %v141_v21, %v173_v26  ;;  %v174_v45 = vld [vmem:[#allocation5 + $0x3c0] sm:$0xff]  ;;  %v334_v47 = vld [vmem:[#allocation5 + $0x3c8] sm:$0xff]  ;;  %v462_v51 = vld [vmem:[#allocation2 + $0x3d0] sm:$0xff] }
  0x5e   :  { %v746_v34 = vadd.f32 %v714_v11, %v586_v22  ;;  %v556_v42 = vmul.f32 %v524_v31, %v524_v31  ;;  %v365_v44 = vsub.f32 %v301_v27, %v333_v28  ;;  %v525_v50 = vsub.f32 %v461_v32, %v493_v33  ;;  %v494_v52 = vld [vmem:[#allocation5 + $0x3d0] sm:$0xff]  ;;  %v622_v57 = vld [vmem:[#allocation2 + $0x3d8] sm:$0xff]  ;;  %v143_v59 = vld [vmem:[#allocation2 + $0x3e0] sm:$0xff] }
  0x5f   :  { %v587_v41 = vadd.f32 %v555_v23, %v427_v29  ;;  %v428_v48 = vadd.f32 %v396_v36, %v236_v35  ;;  %v716_v49 = vmul.f32 %v684_v37, %v684_v37  ;;  %v237_v54 = vmul.f32 %v205_v43, %v205_v43  ;;  %v654_v58 = vld [vmem:[#allocation5 + $0x3d8] sm:$0xff]  ;;  %v175_v0 = vld [vmem:[#allocation5 + $0x3e0] sm:$0xff]  ;;  %v303_v1 = vld [vmem:[#allocation2 + $0x3e8] sm:$0xff] }
  0x60   :  { %v397_v55 = vmul.f32 %v365_v44, %v365_v44  ;;  %v685_v56 = vsub.f32 %v621_v38, %v653_v39  ;;  %810 = vst [vmem:[#allocation7 + $0xd0] sm:$0xff] %v746_v34  ;;  %v557_v61 = vmul.f32 %v525_v50, %v525_v50  ;;  %v206_v62 = vsub.f32 %v142_v40, %v174_v45  ;;  %v335_v2 = vld [vmem:[#allocation5 + $0x3e8] sm:$0xff]  ;;  %v463_v6 = vld [vmem:[#allocation2 + $0x3f0] sm:$0xff]  ;;  %v623_v12 = vld [vmem:[#allocation2 + $0x3f8] sm:$0xff] }
  0x61   :  { %v747_v53 = vadd.f32 %v715_v30, %v587_v41  ;;  %v588_v60 = vadd.f32 %v556_v42, %v428_v48  ;;  %v366_v63 = vsub.f32 %v302_v46, %v334_v47  ;;  %v526_v5 = vsub.f32 %v462_v51, %v494_v52  ;;  %v495_v7 = vld [vmem:[#allocation5 + $0x3f0] sm:$0xff]  ;;  %v655_v13 = vld [vmem:[#allocation5 + $0x3f8] sm:$0xff] }
  0x62   :  { %v429_v3 = vadd.f32 %v397_v55, %v237_v54  ;;  %v717_v4 = vmul.f32 %v685_v56, %v685_v56  ;;  %v238_v9 = vmul.f32 %v206_v62, %v206_v62  ;;  %v686_v11 = vsub.f32 %v622_v57, %v654_v58 }
  0x63   :  { %v748_v8 = vadd.f32 %v716_v49, %v588_v60  ;;  %v398_v10 = vmul.f32 %v366_v63, %v366_v63  ;;  %811 = vst [vmem:[#allocation7 + $0xd8] sm:$0xff] %v747_v53  ;;  %v558_v15 = vmul.f32 %v526_v5, %v526_v5  ;;  %v207_v16 = vsub.f32 %v143_v59, %v175_v0 }
  0x64   :  { %v589_v14 = vadd.f32 %v557_v61, %v429_v3  ;;  %v367_v17 = vsub.f32 %v303_v1, %v335_v2  ;;  %v718_v19 = vmul.f32 %v686_v11, %v686_v11  ;;  %v527_v20 = vsub.f32 %v463_v6, %v495_v7 }
  0x65   :  { %v430_v18 = vadd.f32 %v398_v10, %v238_v9  ;;  %v239_v22 = vmul.f32 %v207_v16, %v207_v16  ;;  %v687_v24 = vsub.f32 %v623_v12, %v655_v13  ;;  %812 = vst [vmem:[#allocation7 + $0xe0] sm:$0xff] %v748_v8 }
  0x66   :  { %v749_v21 = vadd.f32 %v717_v4, %v589_v14  ;;  %v399_v23 = vmul.f32 %v367_v17, %v367_v17  ;;  %v559_v26 = vmul.f32 %v527_v20, %v527_v20 }
  0x67   :  { %v590_v25 = vadd.f32 %v558_v15, %v430_v18  ;;  %v719_v28 = vmul.f32 %v687_v24, %v687_v24 }
  0x68   :  { %v431_v27 = vadd.f32 %v399_v23, %v239_v22  ;;  %813 = vst [vmem:[#allocation7 + $0xe8] sm:$0xff] %v749_v21 }
  0x69   :  { %v750_v29 = vadd.f32 %v718_v19, %v590_v25 }
  0x6a   :  { %v591_v30 = vadd.f32 %v559_v26, %v431_v27 }
  0x6b   :  { %814 = vst [vmem:[#allocation7 + $0xf0] sm:$0xff] %v750_v29 }
  0x6c   :  { %v751_v31 = vadd.f32 %v719_v28, %v591_v30 }
  0x6e   :  { %815 = vst [vmem:[#allocation7 + $0xf8] sm:$0xff] %v751_v31 }
  0x6f   :  { %828 = dma.vmem_to_hbm [thread:$0]  %s821_s1, 4096, %s823_s23, [#allocation4], %s927_s24, %s927_s24, %s928_s25  }
  0x70   :  { %920 = dma.done.wait [#allocation4], 4096  }
  0x71   :  { %921 = vsyncadd [#allocation4], 4294963200 }
  0x72   :  { %833 = vsyncpa [#allocation3], 1 }
  0x73   :  { %834 = vsyncpa [#allocation6], 1 }
  0x74   :  { %835 = vsyncpa [#allocation4], 1 }

</bundles_post_ra>
